<compile_context>
chip_gen: v5e
topology: v5e:2x2
jax: 0.10.0
libtpu: 0.0.40
codegen_flags: <defaults>
</compile_context>

<pallas_src>
import functools

import jax
import jax.numpy as jnp
from jax.experimental import pallas as pl
from jax.experimental.pallas import tpu as pltpu

IN = 4
H1, H2, OUT = 64, 32, 3
H1P, H2P = 128, 128   # lane-padded hidden widths
OUTP = 8              # narrow padded output width (3 -> 8); review item #1


def _sigmoid(z):
    # Single EUP transcendental per element (tanh), instead of exp + reciprocal.
    return 0.5 * jnp.tanh(0.5 * z) + 0.5


def mlp_kernel(x_ref, w1_ref, b1_ref, w2_ref, b2_ref, w3_ref, b3_ref, o_ref):
    x = x_ref[...].astype(jnp.float32)        # (TB, 4)
    w1 = w1_ref[...].astype(jnp.float32)      # (4, 128)

    # ---- layer 1: K=4 contraction as unrolled VPU broadcast-FMAs (skip MXU) ----
    z1 = b1_ref[...]                          # (1, 128) row, broadcasts over TB
    z1 = z1 + x[:, 0:1] * w1[0:1, :]
    z1 = z1 + x[:, 1:2] * w1[1:2, :]
    z1 = z1 + x[:, 2:3] * w1[2:3, :]
    z1 = z1 + x[:, 3:4] * w1[3:4, :]
    h1 = _sigmoid(z1)                         # (TB, 128); cols 64.. are 0.5 filler

    # ---- layer 2: lane-dense MXU matmul, f32 accumulation ----
    # (padded rows 64.. of w2 are zero, so the 0.5 filler columns contribute 0)
    z2 = jnp.dot(h1.astype(w2_ref.dtype), w2_ref[...],
                 preferred_element_type=jnp.float32)
    h2 = _sigmoid(z2 + b2_ref[...])           # (TB, 128)

    # ---- layer 3: (TB, 128) @ (128, 8) -> narrow (TB, 8) logits ----
    z3 = jnp.dot(h2.astype(w3_ref.dtype), w3_ref[...],
                 preferred_element_type=jnp.float32)
    o_ref[...] = (z3 + b3_ref[...]).astype(o_ref.dtype)


def _round_up(n, m):
    return (n + m - 1) // m * m


def _pad_params(params, mm_dtype):
    """Pad params to lane-dense layouts. Exact: padded activation columns hold
    sigmoid(0)=0.5, but the matching *rows* of the next weight are zero, so
    they contribute nothing (0 and 0.5 are exact in bf16 too)."""
    w1, b1, w2, b2, w3, b3 = params
    w1p = jnp.zeros((IN, H1P), jnp.float32).at[:, :H1].set(w1)      # VPU path: keep f32
    b1p = jnp.zeros((1, H1P), jnp.float32).at[:, :H1].set(b1.reshape(1, H1))
    w2p = jnp.zeros((H1P, H2P), jnp.float32).at[:H1, :H2].set(w2).astype(mm_dtype)
    b2p = jnp.zeros((1, H2P), jnp.float32).at[:, :H2].set(b2.reshape(1, H2))
    w3p = jnp.zeros((H2P, OUTP), jnp.float32).at[:H2, :OUT].set(w3).astype(mm_dtype)
    b3p = jnp.zeros((1, OUTP), jnp.float32).at[:, :OUT].set(b3.reshape(1, OUT))
    return w1p, b1p, w2p, b2p, w3p, b3p


def mlp_forward(x, params, *, mm_dtype=jnp.float32, block_b=1024):
    """mm_dtype=jnp.bfloat16 is a valid fast path on v5e/v6e/v7x alike
    (bf16 MXU operands, f32 accumulation / bias / sigmoid)."""
    B = x.shape[0]
    b8 = _round_up(B, 8)
    # Adaptive batch tile: aim for >= 4 grid steps so v7x's 2 TCs each get a
    # double-buffered stream; never exceed block_b or the (8-aligned) batch.
    tb = min(block_b, b8, max(256, _round_up(pl.cdiv(b8, 4), 8)))
    bp = _round_up(b8, tb)
    xp = x.astype(jnp.float32)
    if bp != B:
        xp = jnp.zeros((bp, IN), jnp.float32).at[:B].set(xp)

    w1p, b1p, w2p, b2p, w3p, b3p = _pad_params(params, mm_dtype)

    grid = (bp // tb,)
    const = lambda shape: pl.BlockSpec(shape, lambda i: (0, 0))  # VMEM-resident
    cost = pl.CostEstimate(
        flops=2 * bp * (IN * H1P + H1P * H2P + H2P * OUTP),
        transcendentals=bp * (H1P + H2P),
        bytes_accessed=(xp.size * 4 + bp * OUTP * 4
                        + sum(int(a.size) * a.dtype.itemsize
                              for a in (w1p, b1p, w2p, b2p, w3p, b3p))),
    )

    out = pl.pallas_call(
        mlp_kernel,
        out_shape=jax.ShapeDtypeStruct((bp, OUTP), jnp.float32),
        grid=grid,
        in_specs=[
            pl.BlockSpec((tb, IN), lambda i: (i, 0)),   # streamed per grid step
            const((IN, H1P)), const((1, H1P)),
            const((H1P, H2P)), const((1, H2P)),
            const((H2P, OUTP)), const((1, OUTP)),
        ],
        out_specs=pl.BlockSpec((tb, OUTP), lambda i: (i, 0)),
        compiler_params=pltpu.CompilerParams(
            dimension_semantics=("parallel",)),
        cost_estimate=cost,
    )(xp, w1p, b1p, w2p, b2p, w3p, b3p)

    # Narrow (bp, 8) output -> trailing slice is cheap (no 128-wide copy pass).
    return out[:B, :OUT]


def init_params(key):
    # PyTorch nn.Linear default init: U(-1/sqrt(fan_in), 1/sqrt(fan_in)).
    dims = [(IN, H1), (H1, H2), (H2, OUT)]
    params = []
    for fan_in, fan_out in dims:
        key, kw, kb = jax.random.split(key, 3)
        bound = 1.0 / (fan_in ** 0.5)
        w = jax.random.uniform(kw, (fan_in, fan_out), jnp.float32,
                               minval=-bound, maxval=bound)
        b = jax.random.uniform(kb, (fan_out,), jnp.float32,
                               minval=-bound, maxval=bound)
        params.extend([w, b])
    return params


def reference_forward(x, params):
    w1, b1, w2, b2, w3, b3 = params
    sig = lambda z: 1.0 / (1.0 + jnp.exp(-z))
    h1 = sig(x @ w1 + b1)
    h2 = sig(h1 @ w2 + b2)
    return h2 @ w3 + b3


if __name__ == "__main__":
    key = jax.random.PRNGKey(0)
    key, kx = jax.random.split(key)
    B = 8
    x = jax.random.normal(kx, (B, IN), jnp.float32)
    params = init_params(key)

    ref = reference_forward(x, params)

    # f32 matmul operands (tanh-based sigmoid vs exp-based reference: tiny diff).
    fwd_f32 = jax.jit(mlp_forward)
    out = jax.block_until_ready(fwd_f32(x, params))
    assert out.shape == (B, OUT), out.shape
    assert jnp.allclose(out, ref, atol=1e-4, rtol=1e-4), (
        float(jnp.max(jnp.abs(out - ref))))

    # bf16 matmul operands for layers 2/3 (fine on v5e/v6e/v7x), f32 accumulate.
    fwd_bf16 = jax.jit(functools.partial(mlp_forward, mm_dtype=jnp.bfloat16))
    out_bf16 = jax.block_until_ready(fwd_bf16(x, params))
    assert out_bf16.shape == (B, OUT)
    assert jnp.allclose(out_bf16, ref, atol=1e-1, rtol=1e-1), (
        float(jnp.max(jnp.abs(out_bf16 - ref))))

    print("KERNEL_OK")
</pallas_src>

<mosaic_0001>
module attributes {stable_mosaic.version = 11 : i64} {
  func.func @mlp_kernel(%arg0: i32, %arg1: memref<8x4xf32, #tpu.memory_space<vmem>>, %arg2: memref<4x128xf32, #tpu.memory_space<vmem>>, %arg3: memref<1x128xf32, #tpu.memory_space<vmem>>, %arg4: memref<128x128xf32, #tpu.memory_space<vmem>>, %arg5: memref<1x128xf32, #tpu.memory_space<vmem>>, %arg6: memref<128x8xf32, #tpu.memory_space<vmem>>, %arg7: memref<1x8xf32, #tpu.memory_space<vmem>>, %arg8: memref<8x8xf32, #tpu.memory_space<vmem>>) attributes {dimension_semantics = [#tpu.dimension_semantics<parallel>], iteration_bounds = array<i64: 1>, scalar_prefetch = 0 : i64, scratch_operands = 0 : i64, tpu.core_type = #tpu.core_type<tc>, window_params = [{transform_indices = @transform_0, window_bounds = array<i64: 8, 4>}, {pipeline_mode = #tpu.pipeline_mode<synchronous>, transform_indices = @transform_1, window_bounds = array<i64: 4, 128>}, {pipeline_mode = #tpu.pipeline_mode<synchronous>, transform_indices = @transform_2, window_bounds = array<i64: 1, 128>}, {pipeline_mode = #tpu.pipeline_mode<synchronous>, transform_indices = @transform_3, window_bounds = array<i64: 128, 128>}, {pipeline_mode = #tpu.pipeline_mode<synchronous>, transform_indices = @transform_4, window_bounds = array<i64: 1, 128>}, {pipeline_mode = #tpu.pipeline_mode<synchronous>, transform_indices = @transform_5, window_bounds = array<i64: 128, 8>}, {pipeline_mode = #tpu.pipeline_mode<synchronous>, transform_indices = @transform_6, window_bounds = array<i64: 1, 8>}, {transform_indices = @transform_7, window_bounds = array<i64: 8, 8>}]} {
    %c0 = arith.constant 0 : index
    %c0_0 = arith.constant 0 : index
    %0 = vector.load %arg1[%c0, %c0_0] : memref<8x4xf32, #tpu.memory_space<vmem>>, vector<8x4xf32>
    %c0_1 = arith.constant 0 : index
    %c0_2 = arith.constant 0 : index
    %1 = vector.load %arg2[%c0_1, %c0_2] : memref<4x128xf32, #tpu.memory_space<vmem>>, vector<4x128xf32>
    %c0_3 = arith.constant 0 : index
    %c0_4 = arith.constant 0 : index
    %2 = vector.load %arg3[%c0_3, %c0_4] : memref<1x128xf32, #tpu.memory_space<vmem>>, vector<1x128xf32>
    %3 = vector.extract_strided_slice %0 {offsets = [0, 0], sizes = [8, 1], strides = [1, 1]} : vector<8x4xf32> to vector<8x1xf32>
    %4 = vector.extract_strided_slice %1 {offsets = [0, 0], sizes = [1, 128], strides = [1, 1]} : vector<4x128xf32> to vector<1x128xf32>
    %5 = vector.broadcast %3 : vector<8x1xf32> to vector<8x128xf32>
    %6 = vector.broadcast %4 : vector<1x128xf32> to vector<8x128xf32>
    %7 = arith.mulf %5, %6 : vector<8x128xf32>
    %8 = vector.broadcast %2 : vector<1x128xf32> to vector<8x128xf32>
    %9 = arith.addf %8, %7 : vector<8x128xf32>
    %10 = vector.extract_strided_slice %0 {offsets = [0, 1], sizes = [8, 1], strides = [1, 1]} : vector<8x4xf32> to vector<8x1xf32>
    %11 = vector.extract_strided_slice %1 {offsets = [1, 0], sizes = [1, 128], strides = [1, 1]} : vector<4x128xf32> to vector<1x128xf32>
    %12 = vector.broadcast %10 : vector<8x1xf32> to vector<8x128xf32>
    %13 = vector.broadcast %11 : vector<1x128xf32> to vector<8x128xf32>
    %14 = arith.mulf %12, %13 : vector<8x128xf32>
    %15 = arith.addf %9, %14 : vector<8x128xf32>
    %16 = vector.extract_strided_slice %0 {offsets = [0, 2], sizes = [8, 1], strides = [1, 1]} : vector<8x4xf32> to vector<8x1xf32>
    %17 = vector.extract_strided_slice %1 {offsets = [2, 0], sizes = [1, 128], strides = [1, 1]} : vector<4x128xf32> to vector<1x128xf32>
    %18 = vector.broadcast %16 : vector<8x1xf32> to vector<8x128xf32>
    %19 = vector.broadcast %17 : vector<1x128xf32> to vector<8x128xf32>
    %20 = arith.mulf %18, %19 : vector<8x128xf32>
    %21 = arith.addf %15, %20 : vector<8x128xf32>
    %22 = vector.extract_strided_slice %0 {offsets = [0, 3], sizes = [8, 1], strides = [1, 1]} : vector<8x4xf32> to vector<8x1xf32>
    %23 = vector.extract_strided_slice %1 {offsets = [3, 0], sizes = [1, 128], strides = [1, 1]} : vector<4x128xf32> to vector<1x128xf32>
    %24 = vector.broadcast %22 : vector<8x1xf32> to vector<8x128xf32>
    %25 = vector.broadcast %23 : vector<1x128xf32> to vector<8x128xf32>
    %26 = arith.mulf %24, %25 : vector<8x128xf32>
    %27 = arith.addf %21, %26 : vector<8x128xf32>
    %cst = arith.constant 5.000000e-01 : f32
    %28 = vector.broadcast %cst : f32 to vector<8x128xf32>
    %29 = arith.mulf %28, %27 : vector<8x128xf32>
    %30 = math.tanh %29 : vector<8x128xf32>
    %cst_5 = arith.constant 5.000000e-01 : f32
    %31 = vector.broadcast %cst_5 : f32 to vector<8x128xf32>
    %32 = arith.mulf %31, %30 : vector<8x128xf32>
    %cst_6 = arith.constant 5.000000e-01 : f32
    %33 = vector.broadcast %cst_6 : f32 to vector<8x128xf32>
    %34 = arith.addf %32, %33 : vector<8x128xf32>
    %c0_7 = arith.constant 0 : index
    %c0_8 = arith.constant 0 : index
    %35 = vector.load %arg4[%c0_7, %c0_8] : memref<128x128xf32, #tpu.memory_space<vmem>>, vector<128x128xf32>
    %cst_9 = arith.constant dense<0.000000e+00> : vector<8x128xf32>
    %36 = tpu.matmul %34, %35, %cst_9 {dimension_numbers = #tpu.dot_dimension_numbers<[1], [0], [0], [1], [0, 0, 1, 1], [], []>} : vector<8x128xf32>, vector<128x128xf32>, vector<8x128xf32> -> vector<8x128xf32>
    %c0_10 = arith.constant 0 : index
    %c0_11 = arith.constant 0 : index
    %37 = vector.load %arg5[%c0_10, %c0_11] : memref<1x128xf32, #tpu.memory_space<vmem>>, vector<1x128xf32>
    %38 = vector.broadcast %37 : vector<1x128xf32> to vector<8x128xf32>
    %39 = arith.addf %36, %38 : vector<8x128xf32>
    %cst_12 = arith.constant 5.000000e-01 : f32
    %40 = vector.broadcast %cst_12 : f32 to vector<8x128xf32>
    %41 = arith.mulf %40, %39 : vector<8x128xf32>
    %42 = math.tanh %41 : vector<8x128xf32>
    %cst_13 = arith.constant 5.000000e-01 : f32
    %43 = vector.broadcast %cst_13 : f32 to vector<8x128xf32>
    %44 = arith.mulf %43, %42 : vector<8x128xf32>
    %cst_14 = arith.constant 5.000000e-01 : f32
    %45 = vector.broadcast %cst_14 : f32 to vector<8x128xf32>
    %46 = arith.addf %44, %45 : vector<8x128xf32>
    %c0_15 = arith.constant 0 : index
    %c0_16 = arith.constant 0 : index
    %47 = vector.load %arg6[%c0_15, %c0_16] : memref<128x8xf32, #tpu.memory_space<vmem>>, vector<128x8xf32>
    %cst_17 = arith.constant dense<0.000000e+00> : vector<8x8xf32>
    %48 = tpu.matmul %46, %47, %cst_17 {dimension_numbers = #tpu.dot_dimension_numbers<[1], [0], [0], [1], [0, 0, 1, 1], [], []>} : vector<8x128xf32>, vector<128x8xf32>, vector<8x8xf32> -> vector<8x8xf32>
    %c0_18 = arith.constant 0 : index
    %c0_19 = arith.constant 0 : index
    %49 = vector.load %arg7[%c0_18, %c0_19] : memref<1x8xf32, #tpu.memory_space<vmem>>, vector<1x8xf32>
    %50 = vector.broadcast %49 : vector<1x8xf32> to vector<8x8xf32>
    %51 = arith.addf %48, %50 : vector<8x8xf32>
    %c0_20 = arith.constant 0 : index
    %c0_21 = arith.constant 0 : index
    %52 = vector.load %arg8[%c0_20, %c0_21] : memref<8x8xf32, #tpu.memory_space<vmem>>, vector<8x8xf32>
    tpu.vector_store %arg8[%c0_20, %c0_21], %51 {strides = array<i32>} : memref<8x8xf32, #tpu.memory_space<vmem>>, vector<8x8xf32>,
    return
  }
  func.func @transform_0(%arg0: i32) -> (i32, i32) {
    %c0_i32 = arith.constant 0 : i32
    %c0_i32_0 = arith.constant 0 : i32
    return %arg0, %c0_i32 : i32, i32
  }
  func.func @transform_1(%arg0: i32) -> (i32, i32) {
    %c0_i32 = arith.constant 0 : i32
    %c0_i32_0 = arith.constant 0 : i32
    %c0_i32_1 = arith.constant 0 : i32
    return %c0_i32, %c0_i32_0 : i32, i32
  }
  func.func @transform_2(%arg0: i32) -> (i32, i32) {
    %c0_i32 = arith.constant 0 : i32
    %c0_i32_0 = arith.constant 0 : i32
    %c0_i32_1 = arith.constant 0 : i32
    return %c0_i32, %c0_i32_0 : i32, i32
  }
  func.func @transform_3(%arg0: i32) -> (i32, i32) {
    %c0_i32 = arith.constant 0 : i32
    %c0_i32_0 = arith.constant 0 : i32
    %c0_i32_1 = arith.constant 0 : i32
    return %c0_i32, %c0_i32_0 : i32, i32
  }
  func.func @transform_4(%arg0: i32) -> (i32, i32) {
    %c0_i32 = arith.constant 0 : i32
    %c0_i32_0 = arith.constant 0 : i32
    %c0_i32_1 = arith.constant 0 : i32
    return %c0_i32, %c0_i32_0 : i32, i32
  }
  func.func @transform_5(%arg0: i32) -> (i32, i32) {
    %c0_i32 = arith.constant 0 : i32
    %c0_i32_0 = arith.constant 0 : i32
    %c0_i32_1 = arith.constant 0 : i32
    return %c0_i32, %c0_i32_0 : i32, i32
  }
  func.func @transform_6(%arg0: i32) -> (i32, i32) {
    %c0_i32 = arith.constant 0 : i32
    %c0_i32_0 = arith.constant 0 : i32
    %c0_i32_1 = arith.constant 0 : i32
    return %c0_i32, %c0_i32_0 : i32, i32
  }
  func.func @transform_7(%arg0: i32) -> (i32, i32) {
    %c0_i32 = arith.constant 0 : i32
    %c0_i32_0 = arith.constant 0 : i32
    return %arg0, %c0_i32 : i32, i32
  }
}

</mosaic_0001>

<bundles_post_ra>
// kernel: mlp_forward.1
= control target key start
LH: loop header
LB: loop body
LE: loop exit
PB: predicated region body
PF: predicated region fallthrough
CT: control target
= control target key end

     0   :  { %v171_v0 = vmov 0   ;;  %v172_v2 = vmov 2   ;;  %v173_v4 = vmov 1   ;;  %v174_v5 = vmov 3   ;;  %s329_s0 = inlined_call_operand.vmem [shape: f32[8,4], index: 0, kind: input, shape index: {}]   ;;  %s330_s3 = inlined_call_operand.vmem [shape: f32[128,128], index: 3, kind: input, shape index: {}]   ;;  %s331_s2 = inlined_call_operand.vmem [shape: f32[1,128], index: 2, kind: input, shape index: {}]   ;;  %s332_s4 = inlined_call_operand.vmem [shape: f32[1,128], index: 4, kind: input, shape index: {}]   ;;  %s333_s1 = inlined_call_operand.vmem [shape: f32[4,128], index: 1, kind: input, shape index: {}]   ;;  %s334_s5 = inlined_call_operand.vmem [shape: f32[128,8], index: 5, kind: input, shape index: {}]   ;;  %s335_s6 = inlined_call_operand.vmem [shape: f32[1,8], index: 6, kind: input, shape index: {}]   ;;  %s336_s7 = inlined_call_operand.vmem [shape: f32[8,8], index: 7, kind: output, shape index: {}]  }
   0x1   :  { %159 = vset.pattern.permute.xlu0 %v171_v0  ;;  %v26_v1 = vld [vmem:[%s329_s0] sm:$0xff]  ;;  %161 = vset.pattern.permute.xlu1 %v172_v2  ;;  %v80_v3 = vld [vmem:[%s330_s3 + $0x78] sm:$0xff]  ;;  %v79_v6 = vld [vmem:[%s330_s3 + $0x70] sm:$0xff]  ;;  %vm149_vm0 = vcmask 64512  }
   0x2   :  { %31 = vperm.xlu0 %159, %v26_v1   ;;  %48 = vperm.xlu1 %161, %v26_v1   ;;  %v78_v7 = vld [vmem:[%s330_s3 + $0x68] sm:$0xff]  ;;  %v77_v8 = vld [vmem:[%s330_s3 + $0x60] sm:$0xff]  ;;  %v76_v9 = vld [vmem:[%s330_s3 + $0x58] sm:$0xff] }
   0x3   :  { %85 = vmatpush.msra.mxu0 %v80_v3  ;;  %v75_v10 = vld [vmem:[%s330_s3 + $0x50] sm:$0xff]  ;;  %v74_v11 = vld [vmem:[%s330_s3 + $0x48] sm:$0xff]  ;;  %v73_v12 = vld [vmem:[%s330_s3 + $0x40] sm:$0xff] }
   0x4   :  { %v72_v13 = vld [vmem:[%s330_s3 + $0x38] sm:$0xff]  ;;  %v71_v14 = vld [vmem:[%s330_s3 + $0x30] sm:$0xff]  ;;  %v70_v15 = vld [vmem:[%s330_s3 + $0x28] sm:$0xff] }
   0x5   :  { %86 = vmatpush.msra.mxu0 %v79_v6  ;;  %v69_v16 = vld [vmem:[%s330_s3 + $0x20] sm:$0xff]  ;;  %v68_v17 = vld [vmem:[%s330_s3 + $0x18] sm:$0xff]  ;;  %v67_v18 = vld [vmem:[%s330_s3 + $0x10] sm:$0xff] }
   0x6   :  { %v66_v19 = vld [vmem:[%s330_s3 + $0x8] sm:$0xff]  ;;  %v65_v20 = vld [vmem:[%s330_s3] sm:$0xff]  ;;  %v124_v22 = vld [vmem:[%s334_s5 + $0x78] sm:$0xff] }
   0x7   :  { %87 = vmatpush.msra.mxu0 %v78_v7  ;;  %v27_v21 = vld [vmem:[%s333_s1] sm:$0xf]  ;;  %v123_v23 = vld [vmem:[%s334_s5 + $0x70] sm:$0xff]  ;;  %129 = vmatpush.msra.mxu1 %v124_v22  ;;  %v122_v26 = vld [vmem:[%s334_s5 + $0x68] sm:$0xff] }
   0x8   :  { %v34_v27 = vperm.slane %v27_v21, 0  ;;  %v121_v28 = vld [vmem:[%s334_s5 + $0x60] sm:$0xff]  ;;  %v120_v29 = vld [vmem:[%s334_s5 + $0x58] sm:$0xff]  ;;  %v44_v32 = vperm.slane %v27_v21, 1  ;;  %v119_v33 = vld [vmem:[%s334_s5 + $0x50] sm:$0xff]  ;;  %v51_v34 = vperm.slane %v27_v21, 2 }
   0x9   :  { %88 = vmatpush.msra.mxu0 %v77_v8  ;;  %130 = vmatpush.msra.mxu1 %v123_v23  ;;  %v164_v30 = vld [vmem:[%s331_s2] ss:$0 sm:$0xff]  ;;  %v58_v35 = vperm.slane %v27_v21, 3  ;;  %v118_v38 = vld [vmem:[%s334_s5 + $0x48] sm:$0xff]  ;;  %v116_v51 = vld [vmem:[%s334_s5 + $0x38] sm:$0xff] }
   0xa   :  { %160 = vset.pattern.permute.xlu0 %v173_v4  ;;  %162 = vset.pattern.permute.xlu1 %v174_v5  ;;  %v117_v41 = vld [vmem:[%s334_s5 + $0x40] sm:$0xff]  ;;  %v115_v52 = vld [vmem:[%s334_s5 + $0x30] sm:$0xff]  ;;  %v114_v53 = vld [vmem:[%s334_s5 + $0x28] sm:$0xff] }
   0xb   :  { %41 = vperm.xlu0 %160, %v26_v1   ;;  %55 = vperm.xlu1 %162, %v26_v1   ;;  %v113_v54 = vld [vmem:[%s334_s5 + $0x20] sm:$0xff]  ;;  %v112_v55 = vld [vmem:[%s334_s5 + $0x18] sm:$0xff]  ;;  %v111_v56 = vld [vmem:[%s334_s5 + $0x10] sm:$0xff] }
   0xc   :  { %89 = vmatpush.msra.mxu0 %v76_v9  ;;  %131 = vmatpush.msra.mxu1 %v122_v26  ;;  %v110_v57 = vld [vmem:[%s334_s5 + $0x8] sm:$0xff]  ;;  %v109_v58 = vld [vmem:[%s334_s5] sm:$0xff] }
   0xd   :  { %v165_v59 = vld [vmem:[%s332_s4] ss:$0 sm:$0xff] }
   0xe   :  { %90 = vmatpush.msra.mxu0 %v75_v10  ;;  %132 = vmatpush.msra.mxu1 %v121_v28  ;;  %v166_v2 = vld [vmem:[%s335_s6] ss:$0 sm:$0xff] }
  0x10   :  { %91 = vmatpush.msra.mxu0 %v74_v11  ;;  %133 = vmatpush.msra.mxu1 %v120_v29 }
  0x12   :  { %92 = vmatpush.msra.mxu0 %v73_v12  ;;  %134 = vmatpush.msra.mxu1 %v119_v33 }
  0x13   :  { %163 = vset.pattern.permute.xlu0 %v174_v5 }
  0x14   :  { %93 = vmatpush.msra.mxu0 %v72_v13  ;;  %135 = vmatpush.msra.mxu1 %v118_v38 }
  0x16   :  { %94 = vmatpush.msra.mxu0 %v71_v14  ;;  %136 = vmatpush.msra.mxu1 %v117_v41 }
  0x18   :  { %95 = vmatpush.msra.mxu0 %v70_v15  ;;  %137 = vmatpush.msra.mxu1 %v116_v51 }
  0x1a   :  { %96 = vmatpush.msra.mxu0 %v69_v16  ;;  %138 = vmatpush.msra.mxu1 %v115_v52 }
  0x1c   :  { %97 = vmatpush.msra.mxu0 %v68_v17  ;;  %139 = vmatpush.msra.mxu1 %v114_v53 }
  0x1e   :  { %98 = vmatpush.msra.mxu0 %v67_v18  ;;  %140 = vmatpush.msra.mxu1 %v113_v54 }
  0x20   :  { %99 = vmatpush.msra.mxu0 %v66_v19  ;;  %141 = vmatpush.msra.mxu1 %v112_v55 }
  0x22   :  { %100 = vmatpush.msra.mxu0 %v65_v20  ;;  %142 = vmatpush.msra.mxu1 %v111_v56 }
  0x24   :  { %143 = vmatpush.msra.mxu1 %v110_v57 }
  0x26   :  { %144 = vmatpush.msra.mxu1 %v109_v58 }
  0x74   :  { %v32_v24 = vpop.permute.xlu0 %31  ;;  %v49_v25 = vpop.permute.xlu1 %48 }
  0x75   :  { %v35_v31 = vmul.f32 %v34_v27, %v32_v24  ;;  %v52_v42 = vmul.f32 %v51_v34, %v49_v25 }
  0x77   :  { %v39_v39 = vadd.f32 %v164_v30, %v35_v31 }
  0x7d   :  { %v42_v36 = vpop.permute.xlu0 %41  ;;  %v56_v37 = vpop.permute.xlu1 %55 }
  0x7e   :  { %v45_v40 = vmul.f32 %v44_v32, %v42_v36  ;;  %v59_v44 = vmul.f32 %v58_v35, %v56_v37 }
  0x80   :  { %v46_v43 = vadd.f32 %v45_v40, %v39_v39 }
  0x82   :  { %v53_v45 = vadd.f32 %v52_v42, %v46_v43 }
  0x84   :  { %v60_v46 = vadd.f32 %v59_v44, %v53_v45 }
  0x86   :  { %v61_v47 = vmul.f32 0.5, %v60_v46 }
  0x88   :  { %167 = vtanh.f32 %v61_v47 }
  0x8e   :  { %v168_v48 = vpop.eup %167 }
  0x8f   :  { %v63_v49 = vmul.f32 0.5, %v168_v48 }
  0x91   :  { %v64_v50 = vadd.f32 0.5, %v63_v49 }
  0x93   :  { %101 = vmatmul.f32.vlgmr.msra.gmra.mxu0 %v64_v50 }
 0x110   :  { %v102_v60 = vpop.f32.mrf.mxu0 }
 0x111   :  { %v103_v61 = vadd.f32 %v165_v59, %v102_v60 }
 0x113   :  { %v105_v62 = vmul.f32 0.5, %v103_v61 }
 0x115   :  { %169 = vtanh.f32 %v105_v62 }
 0x11b   :  { %v170_v63 = vpop.eup %169 }
 0x11c   :  { %v107_v0 = vmul.f32 0.5, %v170_v63 }
 0x11e   :  { %v108_v1 = vadd.f32 0.5, %v107_v0 }
 0x120   :  { %145 = vmatmul.f32.vlgmr.msra.gmra.mxu1 %v108_v1 }
 0x19d   :  { %v146_v3 = vpop.f32.mrf.mxu1 }
 0x19e   :  { %v147_v4 = vadd.f32 %v166_v2, %v146_v3 }
 0x1a0   :  { %150 = vst.msk [vmem:[%s336_s7] sm:$0xff] %vm149_vm0, %v147_v4 }

</bundles_post_ra>
